<compile_context>
chip_gen: v5e
topology: v5e:2x2
jax: 0.10.0
libtpu: 0.0.40
codegen_flags: <defaults>
</compile_context>

<pallas_src>
import jax
import jax.numpy as jnp
import numpy as np
from jax.experimental import pallas as pl
from jax.experimental.pallas import tpu as pltpu


# ----------------------------- Pallas kernel -------------------------------
def decoder_step_kernel(ids_ref, h_ref, z_ref, emb_ref,
                        wxz0_ref, wh0_ref, ba0_ref, bhn0_ref,
                        wxz1_ref, wh1_ref, ba1_ref, bhn1_ref,
                        wout_ref, bout_ref,
                        logits_ref, hout_ref):
    """One decoder step: embed + 2-layer latent-conditioned GRU + projection.

    All refs are whole-array VMEM tiles (shapes are small).
      ids_ref : (B, 1) int32 token ids
      h_ref   : (B, 2H) f32   [h_layer0 | h_layer1]   (aliased with hout_ref)
      z_ref   : (B, H)  f32
      emb_ref : (V, E)  bf16
      wxz*    : (E+H or 2H, 3H) bf16   stacked [Wx ; Wz]
      wh*     : (H, 3H) bf16
      ba*     : (1, 3H) f32  pre-summed gate biases (bh_n excluded)
      bhn*    : (1, H)  f32  bh_n (stays inside r*(.))
      wout    : (H, V)  bf16, bout: (1, V) f32
    """
    B = ids_ref.shape[0]
    V, _ = emb_ref.shape
    H = z_ref.shape[-1]

    # --- fused embedding gather: one-hot(ids) @ table (exact, MXU) ---------
    col = jax.lax.broadcasted_iota(jnp.int32, (B, V), 1)
    onehot = jnp.where(col == ids_ref[...], 1.0, 0.0).astype(jnp.bfloat16)
    emb = jnp.dot(onehot, emb_ref[...],
                  preferred_element_type=jnp.float32)          # (B, E) f32

    z = z_ref[...]                                             # (B, H) f32
    z_lo = z.astype(jnp.bfloat16)

    h0 = h_ref[:, 0:H]                                         # (B, H) f32
    h1 = h_ref[:, H:2 * H]

    def gru_cell(xz_lo, h_prev, wxz, wh, b_a, b_hn):
        # xz_lo: (B, K) bf16 = concat([x, z]); single fused gate matmul.
        g = jnp.dot(xz_lo, wxz, preferred_element_type=jnp.float32) + b_a
        gh = jnp.dot(h_prev.astype(jnp.bfloat16), wh,
                     preferred_element_type=jnp.float32)
        r = jax.nn.sigmoid(g[:, 0:H] + gh[:, 0:H])
        u = jax.nn.sigmoid(g[:, H:2 * H] + gh[:, H:2 * H])
        n = jnp.tanh(g[:, 2 * H:] + r * (gh[:, 2 * H:] + b_hn))
        return n + u * (h_prev - n)

    xz0 = jnp.concatenate([emb.astype(jnp.bfloat16), z_lo], axis=1)
    h0_new = gru_cell(xz0, h0, wxz0_ref[...], wh0_ref[...],
                      ba0_ref[...], bhn0_ref[...])

    xz1 = jnp.concatenate([h0_new.astype(jnp.bfloat16), z_lo], axis=1)
    h1_new = gru_cell(xz1, h1, wxz1_ref[...], wh1_ref[...],
                      ba1_ref[...], bhn1_ref[...])

    # lane-dense single-slab store of the new hidden state
    hout_ref[...] = jnp.concatenate([h0_new, h1_new], axis=1)
    logits_ref[...] = (jnp.dot(h1_new.astype(jnp.bfloat16), wout_ref[...],
                               preferred_element_type=jnp.float32)
                       + bout_ref[...])


# ----------------------------- wrapper --------------------------------------
def custom_decoder_forward(inp, hidden, z, kp):
    """inp: (B,) int32 ids; hidden: (2, B, H) f32; z: (1, B, H) f32.

    kp = pack_params(raw_params): kernel-layout (stacked/bf16) weights.
    """
    B = inp.shape[0]
    L, _, H = hidden.shape
    V = kp["wout"].shape[1]
    assert L == 2, "kernel is specialized for n_layers=2 (module default)"

    ids = inp.reshape(B, 1).astype(jnp.int32)
    # hidden as a lane-dense (B, 2H) slab: [layer0 | layer1]
    h_flat = jnp.transpose(hidden, (1, 0, 2)).reshape(B, L * H)
    z2 = jnp.squeeze(z, axis=0)                    # z.squeeze(dim=0)

    vmem = pl.BlockSpec(memory_space=pltpu.MemorySpace.VMEM)
    args = (ids, h_flat, z2, kp["emb"],
            kp["wxz0"], kp["wh0"], kp["ba0"], kp["bhn0"],
            kp["wxz1"], kp["wh1"], kp["ba1"], kp["bhn1"],
            kp["wout"], kp["bout"])

    logits, h_new = pl.pallas_call(
        decoder_step_kernel,
        out_shape=(jax.ShapeDtypeStruct((B, V), jnp.float32),
                   jax.ShapeDtypeStruct((B, L * H), jnp.float32)),
        in_specs=[vmem] * len(args),
        out_specs=(vmem, vmem),
        input_output_aliases={1: 1},               # hidden updated in place
    )(*args)

    new_hidden = jnp.transpose(h_new.reshape(B, L, H), (1, 0, 2))
    return logits, new_hidden


# ----------------------------- param packing --------------------------------
def pack_params(params):
    """Raw (PyTorch-layout) f32 params -> kernel layout (done once, not per step)."""
    H = params["wh0"].shape[0]
    bf16 = jnp.bfloat16

    def fuse(wx, wz):                       # (E,3H)+(H,3H) -> (E+H,3H) bf16
        return jnp.concatenate([wx, wz], axis=0).astype(bf16)

    def bias_a(b):                          # b: (3,3H) rows = [bx, bh, bz]
        full = b[0] + b[1] + b[2]
        # n-gate: bh_n must stay inside r*(h Wh_n + bh_n) -> exclude it here
        return jnp.concatenate([full[:2 * H], (b[0] + b[2])[2 * H:]])[None, :]

    def bias_hn(b):
        return b[1, 2 * H:][None, :]        # (1, H)

    return dict(
        emb=params["embedding"].astype(bf16),
        wxz0=fuse(params["wx0"], params["wz0"]),
        wh0=params["wh0"].astype(bf16),
        ba0=bias_a(params["b0"]), bhn0=bias_hn(params["b0"]),
        wxz1=fuse(params["wx1"], params["wz1"]),
        wh1=params["wh1"].astype(bf16),
        ba1=bias_a(params["b1"]), bhn1=bias_hn(params["b1"]),
        wout=params["wout"].astype(bf16),
        bout=params["bout"],
    )


# ----------------------------- pure-JAX reference ----------------------------
def reference_forward(inp, hidden, z, params):
    """Mirrors the kernel's precision choice: bf16 MXU operands, f32 acc,
    f32 elementwise gate math."""
    bf16 = jnp.bfloat16
    emb = params["embedding"][inp]
    zz = jnp.squeeze(z, axis=0)
    H = hidden.shape[-1]

    def mm(a, b):
        return jnp.dot(a.astype(bf16), b.astype(bf16),
                       preferred_element_type=jnp.float32)

    def cell(x_in, h_prev, wx, wh, wz, b):
        gx = mm(x_in, wx) + b[0]
        gh = mm(h_prev, wh) + b[1]
        gz = mm(zz, wz) + b[2]
        r = jax.nn.sigmoid(gx[:, :H] + gh[:, :H] + gz[:, :H])
        u = jax.nn.sigmoid(gx[:, H:2 * H] + gh[:, H:2 * H] + gz[:, H:2 * H])
        n = jnp.tanh(gx[:, 2 * H:] + r * gh[:, 2 * H:] + gz[:, 2 * H:])
        return n + u * (h_prev - n)

    h0 = cell(emb, hidden[0], params["wx0"], params["wh0"], params["wz0"], params["b0"])
    h1 = cell(h0, hidden[1], params["wx1"], params["wh1"], params["wz1"], params["b1"])
    logits = mm(h1, params["wout"]) + params["bout"][0]
    return logits, jnp.stack([h0, h1])


# ----------------------------- param init -----------------------------------
def init_params(key, vocab_size, embedding_dim, hidden_dim):
    E, H, V = embedding_dim, hidden_dim, vocab_size
    ks = jax.random.split(key, 16)
    bound = 1.0 / np.sqrt(H)

    def u(k, shape, b):
        return jax.random.uniform(k, shape, jnp.float32, -b, b)

    return {
        # nn.Embedding default: N(0, 1)
        "embedding": jax.random.normal(ks[0], (V, E), jnp.float32),
        # layer 0 GRU cell (input dim E)
        "wx0": u(ks[1], (E, 3 * H), bound),
        "wh0": u(ks[2], (H, 3 * H), bound),
        "wz0": u(ks[3], (H, 3 * H), bound),
        "b0":  u(ks[4], (3, 3 * H), bound),
        # layer 1 GRU cell (input dim H)
        "wx1": u(ks[5], (H, 3 * H), bound),
        "wh1": u(ks[6], (H, 3 * H), bound),
        "wz1": u(ks[7], (H, 3 * H), bound),
        "b1":  u(ks[8], (3, 3 * H), bound),
        # rnn2out: init_weights -> U(-0.1, 0.1), bias = 0 (stored as (H, V))
        "wout": jax.random.uniform(ks[9], (H, V), jnp.float32, -0.1, 0.1),
        "bout": jnp.zeros((1, V), jnp.float32),
    }


# ----------------------------- main ------------------------------------------
if __name__ == "__main__":
    B, E, H, V, L = 8, 32, 32, 128, 2

    key = jax.random.PRNGKey(0)
    kparam, ki, kh, kz = jax.random.split(key, 4)

    params = init_params(kparam, V, E, H)
    kp = pack_params(params)                                     # once, outside the step
    inp = jax.random.randint(ki, (B,), 0, V, dtype=jnp.int32)    # token ids
    hidden = jax.random.normal(kh, (L, B, H), jnp.float32)       # init_hidden analogue
    z = jax.random.normal(kz, (1, B, H), jnp.float32)            # latent variable

    fwd = jax.jit(custom_decoder_forward)
    logits, new_hidden = fwd(inp, hidden, z, kp)
    logits = jax.block_until_ready(logits)
    new_hidden = jax.block_until_ready(new_hidden)

    ref_logits, ref_hidden = reference_forward(inp, hidden, z, params)
    assert logits.shape == (B, V) and new_hidden.shape == (L, B, H)
    assert np.allclose(np.asarray(logits), np.asarray(ref_logits), atol=5e-3, rtol=5e-3)
    assert np.allclose(np.asarray(new_hidden), np.asarray(ref_hidden), atol=5e-3, rtol=5e-3)

    print("KERNEL_OK")
</pallas_src>

<mosaic_0001>
module attributes {stable_mosaic.version = 11 : i64} {
  func.func @decoder_step_kernel(%arg0: memref<8x1xi32, #tpu.memory_space<vmem>>, %arg1: memref<8x64xf32, #tpu.memory_space<vmem>>, %arg2: memref<8x32xf32, #tpu.memory_space<vmem>>, %arg3: memref<128x32xbf16, #tpu.memory_space<vmem>>, %arg4: memref<64x96xbf16, #tpu.memory_space<vmem>>, %arg5: memref<32x96xbf16, #tpu.memory_space<vmem>>, %arg6: memref<1x96xf32, #tpu.memory_space<vmem>>, %arg7: memref<1x32xf32, #tpu.memory_space<vmem>>, %arg8: memref<64x96xbf16, #tpu.memory_space<vmem>>, %arg9: memref<32x96xbf16, #tpu.memory_space<vmem>>, %arg10: memref<1x96xf32, #tpu.memory_space<vmem>>, %arg11: memref<1x32xf32, #tpu.memory_space<vmem>>, %arg12: memref<32x128xbf16, #tpu.memory_space<vmem>>, %arg13: memref<1x128xf32, #tpu.memory_space<vmem>>, %arg14: memref<8x128xf32, #tpu.memory_space<vmem>>, %arg15: memref<8x64xf32, #tpu.memory_space<vmem>>) attributes {dimension_semantics = [], scalar_prefetch = 0 : i64, scratch_operands = 0 : i64, tpu.core_type = #tpu.core_type<tc>} {
    %0 = tpu.iota {dimensions = array<i32: 1>} : vector<8x128xi32>
    %c0 = arith.constant 0 : index
    %c0_0 = arith.constant 0 : index
    %1 = vector.load %arg0[%c0, %c0_0] : memref<8x1xi32, #tpu.memory_space<vmem>>, vector<8x1xi32>
    %2 = vector.broadcast %1 : vector<8x1xi32> to vector<8x128xi32>
    %3 = arith.cmpi eq, %0, %2 : vector<8x128xi32>
    %cst = arith.constant 1.000000e+00 : f32
    %cst_1 = arith.constant 0.000000e+00 : f32
    %4 = vector.broadcast %cst : f32 to vector<8x128xf32>
    %5 = vector.broadcast %cst_1 : f32 to vector<8x128xf32>
    %6 = arith.select %3, %4, %5 : vector<8x128xi1>, vector<8x128xf32>
    %7 = arith.truncf %6 : vector<8x128xf32> to vector<8x128xbf16>
    %c0_2 = arith.constant 0 : index
    %c0_3 = arith.constant 0 : index
    %8 = vector.load %arg3[%c0_2, %c0_3] : memref<128x32xbf16, #tpu.memory_space<vmem>>, vector<128x32xbf16>
    %cst_4 = arith.constant dense<0.000000e+00> : vector<8x32xf32>
    %9 = tpu.matmul %7, %8, %cst_4 {dimension_numbers = #tpu.dot_dimension_numbers<[1], [0], [0], [1], [0, 0, 1, 1], [], []>} : vector<8x128xbf16>, vector<128x32xbf16>, vector<8x32xf32> -> vector<8x32xf32>
    %c0_5 = arith.constant 0 : index
    %c0_6 = arith.constant 0 : index
    %10 = vector.load %arg2[%c0_5, %c0_6] : memref<8x32xf32, #tpu.memory_space<vmem>>, vector<8x32xf32>
    %11 = arith.truncf %10 : vector<8x32xf32> to vector<8x32xbf16>
    %c0_7 = arith.constant 0 : index
    %c0_8 = arith.constant 0 : index
    %12 = vector.load %arg1[%c0_7, %c0_8] : memref<8x64xf32, #tpu.memory_space<vmem>>, vector<8x32xf32>
    %c0_9 = arith.constant 0 : index
    %c32 = arith.constant 32 : index
    %13 = vector.load %arg1[%c0_9, %c32] : memref<8x64xf32, #tpu.memory_space<vmem>>, vector<8x32xf32>
    %14 = arith.truncf %9 : vector<8x32xf32> to vector<8x32xbf16>
    %15 = tpu.concatenate %14, %11 in 1 : vector<8x32xbf16>, vector<8x32xbf16> -> vector<8x64xbf16>
    %c0_10 = arith.constant 0 : index
    %c0_11 = arith.constant 0 : index
    %16 = vector.load %arg4[%c0_10, %c0_11] : memref<64x96xbf16, #tpu.memory_space<vmem>>, vector<64x96xbf16>
    %c0_12 = arith.constant 0 : index
    %c0_13 = arith.constant 0 : index
    %17 = vector.load %arg5[%c0_12, %c0_13] : memref<32x96xbf16, #tpu.memory_space<vmem>>, vector<32x96xbf16>
    %c0_14 = arith.constant 0 : index
    %c0_15 = arith.constant 0 : index
    %18 = vector.load %arg6[%c0_14, %c0_15] : memref<1x96xf32, #tpu.memory_space<vmem>>, vector<1x96xf32>
    %c0_16 = arith.constant 0 : index
    %c0_17 = arith.constant 0 : index
    %19 = vector.load %arg7[%c0_16, %c0_17] : memref<1x32xf32, #tpu.memory_space<vmem>>, vector<1x32xf32>
    %cst_18 = arith.constant dense<0.000000e+00> : vector<8x96xf32>
    %20 = tpu.matmul %15, %16, %cst_18 {dimension_numbers = #tpu.dot_dimension_numbers<[1], [0], [0], [1], [0, 0, 1, 1], [], []>} : vector<8x64xbf16>, vector<64x96xbf16>, vector<8x96xf32> -> vector<8x96xf32>
    %21 = vector.broadcast %18 : vector<1x96xf32> to vector<8x96xf32>
    %22 = arith.addf %20, %21 : vector<8x96xf32>
    %23 = arith.truncf %12 : vector<8x32xf32> to vector<8x32xbf16>
    %cst_19 = arith.constant dense<0.000000e+00> : vector<8x96xf32>
    %24 = tpu.matmul %23, %17, %cst_19 {dimension_numbers = #tpu.dot_dimension_numbers<[1], [0], [0], [1], [0, 0, 1, 1], [], []>} : vector<8x32xbf16>, vector<32x96xbf16>, vector<8x96xf32> -> vector<8x96xf32>
    %25 = vector.extract_strided_slice %22 {offsets = [0, 0], sizes = [8, 32], strides = [1, 1]} : vector<8x96xf32> to vector<8x32xf32>
    %26 = vector.extract_strided_slice %24 {offsets = [0, 0], sizes = [8, 32], strides = [1, 1]} : vector<8x96xf32> to vector<8x32xf32>
    %27 = arith.addf %25, %26 : vector<8x32xf32>
    %28 = arith.negf %27 : vector<8x32xf32>
    %29 = math.exp %28 : vector<8x32xf32>
    %cst_20 = arith.constant 1.000000e+00 : f32
    %30 = vector.broadcast %cst_20 : f32 to vector<8x32xf32>
    %31 = arith.addf %30, %29 : vector<8x32xf32>
    %32 = arith.divf %30, %31 : vector<8x32xf32>
    %33 = vector.extract_strided_slice %22 {offsets = [0, 32], sizes = [8, 32], strides = [1, 1]} : vector<8x96xf32> to vector<8x32xf32>
    %34 = vector.extract_strided_slice %24 {offsets = [0, 32], sizes = [8, 32], strides = [1, 1]} : vector<8x96xf32> to vector<8x32xf32>
    %35 = arith.addf %33, %34 : vector<8x32xf32>
    %36 = arith.negf %35 : vector<8x32xf32>
    %37 = math.exp %36 : vector<8x32xf32>
    %cst_21 = arith.constant 1.000000e+00 : f32
    %38 = vector.broadcast %cst_21 : f32 to vector<8x32xf32>
    %39 = arith.addf %38, %37 : vector<8x32xf32>
    %40 = arith.divf %38, %39 : vector<8x32xf32>
    %41 = vector.extract_strided_slice %22 {offsets = [0, 64], sizes = [8, 32], strides = [1, 1]} : vector<8x96xf32> to vector<8x32xf32>
    %42 = vector.extract_strided_slice %24 {offsets = [0, 64], sizes = [8, 32], strides = [1, 1]} : vector<8x96xf32> to vector<8x32xf32>
    %43 = vector.broadcast %19 : vector<1x32xf32> to vector<8x32xf32>
    %44 = arith.addf %42, %43 : vector<8x32xf32>
    %45 = arith.mulf %32, %44 : vector<8x32xf32>
    %46 = arith.addf %41, %45 : vector<8x32xf32>
    %47 = math.tanh %46 : vector<8x32xf32>
    %48 = arith.subf %12, %47 : vector<8x32xf32>
    %49 = arith.mulf %40, %48 : vector<8x32xf32>
    %50 = arith.addf %47, %49 : vector<8x32xf32>
    %51 = arith.truncf %50 : vector<8x32xf32> to vector<8x32xbf16>
    %52 = tpu.concatenate %51, %11 in 1 : vector<8x32xbf16>, vector<8x32xbf16> -> vector<8x64xbf16>
    %c0_22 = arith.constant 0 : index
    %c0_23 = arith.constant 0 : index
    %53 = vector.load %arg8[%c0_22, %c0_23] : memref<64x96xbf16, #tpu.memory_space<vmem>>, vector<64x96xbf16>
    %c0_24 = arith.constant 0 : index
    %c0_25 = arith.constant 0 : index
    %54 = vector.load %arg9[%c0_24, %c0_25] : memref<32x96xbf16, #tpu.memory_space<vmem>>, vector<32x96xbf16>
    %c0_26 = arith.constant 0 : index
    %c0_27 = arith.constant 0 : index
    %55 = vector.load %arg10[%c0_26, %c0_27] : memref<1x96xf32, #tpu.memory_space<vmem>>, vector<1x96xf32>
    %c0_28 = arith.constant 0 : index
    %c0_29 = arith.constant 0 : index
    %56 = vector.load %arg11[%c0_28, %c0_29] : memref<1x32xf32, #tpu.memory_space<vmem>>, vector<1x32xf32>
    %cst_30 = arith.constant dense<0.000000e+00> : vector<8x96xf32>
    %57 = tpu.matmul %52, %53, %cst_30 {dimension_numbers = #tpu.dot_dimension_numbers<[1], [0], [0], [1], [0, 0, 1, 1], [], []>} : vector<8x64xbf16>, vector<64x96xbf16>, vector<8x96xf32> -> vector<8x96xf32>
    %58 = vector.broadcast %55 : vector<1x96xf32> to vector<8x96xf32>
    %59 = arith.addf %57, %58 : vector<8x96xf32>
    %60 = arith.truncf %13 : vector<8x32xf32> to vector<8x32xbf16>
    %cst_31 = arith.constant dense<0.000000e+00> : vector<8x96xf32>
    %61 = tpu.matmul %60, %54, %cst_31 {dimension_numbers = #tpu.dot_dimension_numbers<[1], [0], [0], [1], [0, 0, 1, 1], [], []>} : vector<8x32xbf16>, vector<32x96xbf16>, vector<8x96xf32> -> vector<8x96xf32>
    %62 = vector.extract_strided_slice %59 {offsets = [0, 0], sizes = [8, 32], strides = [1, 1]} : vector<8x96xf32> to vector<8x32xf32>
    %63 = vector.extract_strided_slice %61 {offsets = [0, 0], sizes = [8, 32], strides = [1, 1]} : vector<8x96xf32> to vector<8x32xf32>
    %64 = arith.addf %62, %63 : vector<8x32xf32>
    %65 = arith.negf %64 : vector<8x32xf32>
    %66 = math.exp %65 : vector<8x32xf32>
    %cst_32 = arith.constant 1.000000e+00 : f32
    %67 = vector.broadcast %cst_32 : f32 to vector<8x32xf32>
    %68 = arith.addf %67, %66 : vector<8x32xf32>
    %69 = arith.divf %67, %68 : vector<8x32xf32>
    %70 = vector.extract_strided_slice %59 {offsets = [0, 32], sizes = [8, 32], strides = [1, 1]} : vector<8x96xf32> to vector<8x32xf32>
    %71 = vector.extract_strided_slice %61 {offsets = [0, 32], sizes = [8, 32], strides = [1, 1]} : vector<8x96xf32> to vector<8x32xf32>
    %72 = arith.addf %70, %71 : vector<8x32xf32>
    %73 = arith.negf %72 : vector<8x32xf32>
    %74 = math.exp %73 : vector<8x32xf32>
    %cst_33 = arith.constant 1.000000e+00 : f32
    %75 = vector.broadcast %cst_33 : f32 to vector<8x32xf32>
    %76 = arith.addf %75, %74 : vector<8x32xf32>
    %77 = arith.divf %75, %76 : vector<8x32xf32>
    %78 = vector.extract_strided_slice %59 {offsets = [0, 64], sizes = [8, 32], strides = [1, 1]} : vector<8x96xf32> to vector<8x32xf32>
    %79 = vector.extract_strided_slice %61 {offsets = [0, 64], sizes = [8, 32], strides = [1, 1]} : vector<8x96xf32> to vector<8x32xf32>
    %80 = vector.broadcast %56 : vector<1x32xf32> to vector<8x32xf32>
    %81 = arith.addf %79, %80 : vector<8x32xf32>
    %82 = arith.mulf %69, %81 : vector<8x32xf32>
    %83 = arith.addf %78, %82 : vector<8x32xf32>
    %84 = math.tanh %83 : vector<8x32xf32>
    %85 = arith.subf %13, %84 : vector<8x32xf32>
    %86 = arith.mulf %77, %85 : vector<8x32xf32>
    %87 = arith.addf %84, %86 : vector<8x32xf32>
    %88 = tpu.concatenate %50, %87 in 1 : vector<8x32xf32>, vector<8x32xf32> -> vector<8x64xf32>
    %c0_34 = arith.constant 0 : index
    %c0_35 = arith.constant 0 : index
    %89 = vector.load %arg15[%c0_34, %c0_35] : memref<8x64xf32, #tpu.memory_space<vmem>>, vector<8x64xf32>
    tpu.vector_store %arg15[%c0_34, %c0_35], %88 {strides = array<i32>} : memref<8x64xf32, #tpu.memory_space<vmem>>, vector<8x64xf32>,
    %90 = arith.truncf %87 : vector<8x32xf32> to vector<8x32xbf16>
    %c0_36 = arith.constant 0 : index
    %c0_37 = arith.constant 0 : index
    %91 = vector.load %arg12[%c0_36, %c0_37] : memref<32x128xbf16, #tpu.memory_space<vmem>>, vector<32x128xbf16>
    %cst_38 = arith.constant dense<0.000000e+00> : vector<8x128xf32>
    %92 = tpu.matmul %90, %91, %cst_38 {dimension_numbers = #tpu.dot_dimension_numbers<[1], [0], [0], [1], [0, 0, 1, 1], [], []>} : vector<8x32xbf16>, vector<32x128xbf16>, vector<8x128xf32> -> vector<8x128xf32>
    %c0_39 = arith.constant 0 : index
    %c0_40 = arith.constant 0 : index
    %93 = vector.load %arg13[%c0_39, %c0_40] : memref<1x128xf32, #tpu.memory_space<vmem>>, vector<1x128xf32>
    %94 = vector.broadcast %93 : vector<1x128xf32> to vector<8x128xf32>
    %95 = arith.addf %92, %94 : vector<8x128xf32>
    %c0_41 = arith.constant 0 : index
    %c0_42 = arith.constant 0 : index
    %96 = vector.load %arg14[%c0_41, %c0_42] : memref<8x128xf32, #tpu.memory_space<vmem>>, vector<8x128xf32>
    tpu.vector_store %arg14[%c0_41, %c0_42], %95 {strides = array<i32>} : memref<8x128xf32, #tpu.memory_space<vmem>>, vector<8x128xf32>,
    return
  }
}

</mosaic_0001>

<bundles_post_ra>
// kernel: custom_decoder_forward.1
= control target key start
LH: loop header
LB: loop body
LE: loop exit
PB: predicated region body
PF: predicated region fallthrough
CT: control target
= control target key end

     0   :  { %v671_v2 = vmov 0   ;;  %s889_s0 = inlined_call_operand.vmem [shape: s32[8,1], index: 0, kind: input, shape index: {}]   ;;  %s890_s1 = inlined_call_operand.vmem [shape: f32[8,64], index: 1, kind: input, shape index: {}, may-alias: {1,15}]   ;;  %s891_s2 = inlined_call_operand.vmem [shape: f32[8,32], index: 2, kind: input, shape index: {}]   ;;  %s892_s3 = inlined_call_operand.vmem [shape: bf16[128,32], index: 3, kind: input, shape index: {}]   ;;  %s893_s4 = inlined_call_operand.vmem [shape: bf16[64,96], index: 4, kind: input, shape index: {}]   ;;  %s894_s5 = inlined_call_operand.vmem [shape: bf16[32,96], index: 5, kind: input, shape index: {}]   ;;  %s895_s6 = inlined_call_operand.vmem [shape: f32[1,96], index: 6, kind: input, shape index: {}]   ;;  %s896_s7 = inlined_call_operand.vmem [shape: f32[1,32], index: 7, kind: input, shape index: {}]   ;;  %s897_s8 = inlined_call_operand.vmem [shape: bf16[64,96], index: 8, kind: input, shape index: {}]   ;;  %s898_s9 = inlined_call_operand.vmem [shape: bf16[32,96], index: 9, kind: input, shape index: {}]   ;;  %s899_s10 = inlined_call_operand.vmem [shape: f32[1,96], index: 10, kind: input, shape index: {}]   ;;  %s900_s11 = inlined_call_operand.vmem [shape: f32[1,32], index: 11, kind: input, shape index: {}]   ;;  %s901_s12 = inlined_call_operand.vmem [shape: bf16[32,128], index: 12, kind: input, shape index: {}]   ;;  %s902_s13 = inlined_call_operand.vmem [shape: f32[1,128], index: 13, kind: input, shape index: {}]   ;;  %s903_s14 = inlined_call_operand.hbm [shape: f32[8,128], index: 14, kind: output, shape index: {0}]   ;;  %s904_s15 = inlined_call_operand.vmem [shape: f32[8,64], index: 15, kind: output, shape index: {1}, may-alias: {1,15}]  }
   0x1   :  { %v53_v0 = vld [vmem:[%s889_s0] sm:$0xff]  ;;  %v606_v1 = vld [vmem:[%s892_s3 + $0x38] sm:$0xff]  ;;  %627 = vset.pattern.permute.xlu0 %v671_v2  ;;  %v605_v3 = vld [vmem:[%s892_s3 + $0x30] sm:$0xff] }
   0x2   :  { %55 = vperm.xlu0 %627, %v53_v0   ;;  %124 = vmatpush.bf16.msra.mxu0 %v606_v1 }
   0x3   :  { %21 = vsyncpa [#allocation3], 0  ;;  %v604_v4 = vld [vmem:[%s892_s3 + $0x28] sm:$0xff]  ;;  %v603_v5 = vld [vmem:[%s892_s3 + $0x20] sm:$0xff]  ;;  %s672_s29 = smov 64   ;;  %vm146_vm0 = vcmask 261120   ;;  %v51_v22 = vlaneseq }
   0x4   :  { %v602_v6 = vld [vmem:[%s892_s3 + $0x18] sm:$0xff]  ;;  %v601_v7 = vld [vmem:[%s892_s3 + $0x10] sm:$0xff]  ;;  %v600_v8 = vld [vmem:[%s892_s3 + $0x8] sm:$0xff]  ;;  %v674_v25 = vmov 1.0|1.0   ;;  %vm191_vm3 = vcmask 523264  }
   0x5   :  { %v599_v9 = vld [vmem:[%s892_s3] sm:$0xff]  ;;  %v612_v11 = vld [vmem:[%s894_s5 + $0x8] sm:$0xff]  ;;  %v610_v14 = vld [vmem:[%s893_s4 + $0x18] sm:$0xff]  ;;  %v52_v23 = vand.u32 127, %v51_v22  ;;  %s676_s19 = smov [#allocation2]   ;;  %s489_s20 = sshll.u32 %s903_s14, 4  ;;  %s490_s20 = int_to_ptr.hbm [resolvable:$true] %s489_s20 }
   0x6   :  { %125 = vmatpush.bf16.msra.mxu0 %v605_v3  ;;  %v137_v10 = vld [vmem:[%s891_s2] sm:$0xff]  ;;  %229 = vmatpush.bf16.msra.mxu2 %v612_v11  ;;  %v609_v18 = vld [vmem:[%s893_s4 + $0x10] sm:$0xff]  ;;  %v608_v21 = vld [vmem:[%s893_s4 + $0x8] sm:$0xff] }
   0x7   :  { %v138_v12 = vpack.c.bf16 %v137_v10, %v137_v10  ;;  %v628_v13 = vld [vmem:[%s896_s7] ss:$0 sm:$0xff]  ;;  %198 = vmatpush.bf16.msra.mxu1 %v610_v14  ;;  %v618_v63 = vld [vmem:[%s898_s9 + $0x8] sm:$0xff]  ;;  %v616_v1 = vld [vmem:[%s897_s8 + $0x18] sm:$0xff] }
   0x8   :  { %v611_v15 = vld [vmem:[%s894_s5] sm:$0xff]  ;;  %258 = vrot.lane.b32.xlu1 %v628_v13, %s672_s29  ;;  %s673_s5 = smov 32   ;;  %343 = vmatpush.bf16.msra.mxu3 %v616_v1  ;;  %v615_v3 = vld [vmem:[%s897_s8 + $0x10] sm:$0xff] }
   0x9   :  { %v802_v16 = vld [vmem:[%s890_s1] sm:$0xff]  ;;  %v142_v17 = vunpack.c.l.b16 %v138_v12 }
   0xa   :  { %126 = vmatpush.bf16.msra.mxu0 %v604_v4  ;;  %v207_v20 = vpack.c.bf16 %v802_v16, %v802_v16  ;;  %230 = vmatpush.bf16.msra.mxu2 %v611_v15  ;;  %v607_v26 = vld [vmem:[%s893_s4] sm:$0xff]  ;;  %s487_s4 = sshll.u32 %s676_s19, 4  ;;  %s488_s4 = int_to_ptr.vmem [resolvable:$true] %s487_s4 }
   0xb   :  { %v143_v19 = vpack.c.b16 %v142_v17, %v142_v17  ;;  %199 = vmatpush.bf16.msra.mxu1 %v609_v18  ;;  %v629_v36 = vld [vmem:[%s895_s6] ss:$0 sm:$0xff]  ;;  %s675_s6 = smov 96  }
   0xc   :  { %v630_v0 = vld [vmem:[%s900_s11] ss:$0 sm:$0xff]  ;;  %344 = vmatpush.bf16.msra.mxu3 %v615_v3 }
   0xd   :  { %144 = vrot.lane.b32.xlu0 %v143_v19, %s673_s5  ;;  %561 = vmatmul.msk.bf16.vlgmr.msra.gmra.mxu2 %vm146_vm0, %v207_v20  ;;  %v617_v2 = vld [vmem:[%s898_s9] sm:$0xff] }
   0xe   :  { %127 = vmatpush.bf16.msra.mxu0 %v603_v5  ;;  %376 = vmatpush.bf16.msrb.mxu2 %v618_v63  ;;  %v614_v5 = vld [vmem:[%s897_s8 + $0x8] sm:$0xff]  ;;  %v631_v19 = vld [vmem:[%s899_s10] ss:$0 sm:$0xff] }
   0xf   :  { %200 = vmatpush.bf16.msra.mxu1 %v608_v21 }
  0x10   :  { %345 = vmatpush.bf16.msra.mxu3 %v614_v5 }
  0x12   :  { %128 = vmatpush.bf16.msra.mxu0 %v602_v6  ;;  %377 = vmatpush.bf16.msrb.mxu2 %v617_v2  ;;  %v613_v6 = vld [vmem:[%s897_s8] sm:$0xff] }
  0x13   :  { %201 = vmatpush.bf16.msra.mxu1 %v607_v26 }
  0x14   :  { %346 = vmatpush.bf16.msra.mxu3 %v613_v6 }
  0x16   :  { %129 = vmatpush.bf16.msra.mxu0 %v601_v7 }
  0x1a   :  { %130 = vmatpush.bf16.msra.mxu0 %v600_v8 }
  0x1e   :  { %131 = vmatpush.bf16.msra.mxu0 %v599_v9 }
  0x74   :  { %v56_v24 = vpop.permute.xlu0 %55 }
  0x75   :  { %vm57_vm1 = vcmp.eq.s32.totalorder %v52_v23, %v56_v24 }
  0x76   :  { %vm534_vm2 = vmpackc.low %vm57_vm1, %vm57_vm1 }
  0x77   :  { %535 = vmatmul.msk.bf16.vlgmr.msra.gmra.mxu0 %vm534_vm2, %v674_v25 }
  0x7a   :  { %v259_v27 = vpop.permute.xlu1 %258 }
  0x7f   :  { %v819_v32 = vpop.permute.xlu0 %144 }
  0x90   :  { %v232_v28 = vpop.f32.mrf.mxu2 }
  0x91   :  { %v261_v29 = vadd.f32 %v259_v27, %v232_v28 }
  0x93   :  { %263 = vrot.lane.b32.xlu1 %v261_v29, %s672_s29 }
  0x98   :  { %v234_v30 = vpop.f32.mrf.mxu2 }
  0xf4   :  { %v133_v31 = vpop.f32.mrf.mxu0 }
  0xf5   :  { %v140_v33 = vpack.c.bf16 %v133_v31, %v133_v31 }
  0xf7   :  { %v149_v34 = vsel %vm146_vm0, %v140_v33, %v819_v32 }
  0xf8   :  { %552 = vmatmul.msk.bf16.vlgmr.msra.gmra.mxu1 %vm191_vm3, %v149_v34 }
  0xfc   :  { %v135_v35 = vpop.f32.mrf.mxu0 }
 0x105   :  { %v264_v51 = vpop.permute.xlu1 %263 }
 0x175   :  { %v203_v37 = vpop.f32.mrf.mxu1 }
 0x176   :  { %v204_v38 = vadd.f32 %v629_v36, %v203_v37 }
 0x178   :  { %v236_v39 = vadd.f32 %v232_v28, %v204_v38 }
 0x17a   :  { %v562_v40 = vmul.f32 -1.442695, %v236_v39 }
 0x17c   :  { %633 = vpow2.f32 %v562_v40 }
 0x17d   :  { %v205_v41 = vpop.f32.mrf.mxu1 }
 0x182   :  { %v634_v42 = vpop.eup %633 }
 0x183   :  { %v240_v43 = vadd.f32 1.0, %v634_v42 }
 0x185   :  { %635 = vrcp.f32 %v240_v43  ;;  %v252_v47 = vand.u32 2147483648, %v240_v43  ;;  %v250_v49 = vand.u32 2147483647, %v240_v43  ;;  %vm246_vm5 = vweird.f32 %v240_v43 }
 0x187   :  { %v253_v52 = vor.u32 1.1754944e-38, %v252_v47  ;;  %vm251_vm7 = vcmp.eq.f32.partialorder %v250_v49, 8.507059e+37  ;;  %v619_v49 = vld [vmem:[%s901_s12] sm:$0xff] }
 0x18b   :  { %v636_v44 = vpop.eup %635 }
 0x18c   :  { %v242_v45 = vmul.f32 %v636_v44, %v240_v43  ;;  %vm247_vm4 = vweird.f32 %v636_v44 }
 0x18d   :  { %vm248_vm6 = vmor %vm246_vm5, %vm247_vm4 }
 0x18e   :  { %v243_v46 = vsub.f32 1.0, %v242_v45 }
 0x190   :  { %v244_v48 = vmul.f32 %v636_v44, %v243_v46 }
 0x192   :  { %v245_v50 = vadd.f32 %v636_v44, %v244_v48  ;;  %v620_v48 = vld [vmem:[%s901_s12 + $0x8] sm:$0xff] }
 0x193   :  { %474 = vmatpush.bf16.msrb.mxu1 %v620_v48 }
 0x194   :  { %v249_v53 = vsel %vm248_vm6, %v636_v44, %v245_v50 }
 0x195   :  { %v254_v54 = vsel %vm251_vm7, %v253_v52, %v249_v53  ;;  %v632_v53 = vld [vmem:[%s902_s13] ss:$0 sm:$0xff] }
 0x196   :  { %v266_v55 = vmul.f32 %v264_v51, %v254_v54 }
 0x197   :  { %475 = vmatpush.bf16.msrb.mxu1 %v619_v49 }
 0x198   :  { %268 = vrot.lane.b32.xlu2 %v266_v55, %s672_s29 }
 0x1f2   :  { %v269_v56 = vpop.permute.xlu2 %268 }
 0x1f3   :  { %v271_v57 = vadd.f32 %v269_v56, %v204_v38 }
 0x1f5   :  { %637 = vtanh.f32 %v271_v57 }
 0x1fb   :  { %v638_v58 = vpop.eup %637 }
 0x1fc   :  { %274 = vrot.lane.b32.xlu2 %v638_v58, %s672_s29 }
 0x204   :  { %353 = vrot.lane.b32.xlu2 %v207_v20, %s675_s6 }
 0x256   :  { %v275_v59 = vpop.permute.xlu2 %274 }
 0x257   :  { %v277_v60 = vsub.f32 %v802_v16, %v275_v59 }
 0x259   :  { %279 = vrot.lane.b32.xlu0 %v277_v60, %s673_s5 }
 0x25e   :  { %v354_v4 = vpop.permute.xlu2 %353 }
 0x25f   :  { %588 = vmatmul.msk.bf16.vlgmr.msrb.gmra.mxu2 %vm146_vm0, %v354_v4 }
 0x2cb   :  { %v280_v61 = vpop.permute.xlu0 %279 }
 0x2cc   :  { %v282_v62 = vmul.f32 %v280_v61, %v254_v54 }
 0x2ce   :  { %284 = vrot.lane.b32.xlu1 %v282_v62, %s673_s5 }
 0x2d6   :  { %405 = vrot.lane.b32.xlu1 %v630_v0, %s672_s29 }
 0x2e2   :  { %v379_v13 = vpop.f32.mrf.mxu2 }
 0x2ea   :  { %v381_v18 = vpop.f32.mrf.mxu2 }
 0x340   :  { %v285_v7 = vpop.permute.xlu1 %284 }
 0x341   :  { %v287_v8 = vadd.f32 %v638_v58, %v285_v7 }
 0x343   :  { %v288_v9 = vpack.c.bf16 %v287_v8, %v287_v8 }
 0x345   :  { %v290_v10 = vunpack.c.l.b16 %v288_v9 }
 0x347   :  { %v291_v11 = vpack.c.b16 %v290_v10, %v290_v10 }
 0x348   :  { %v406_v12 = vpop.permute.xlu1 %405 }
 0x349   :  { %292 = vrot.lane.b32.xlu0 %v291_v11, %s672_s29  ;;  %v408_v14 = vadd.f32 %v406_v12, %v379_v13 }
 0x34b   :  { %410 = vrot.lane.b32.xlu2 %v408_v14, %s672_s29 }
 0x3a5   :  { %v411_v34 = vpop.permute.xlu2 %410 }
 0x3bb   :  { %v293_v15 = vpop.permute.xlu0 %292 }
 0x3bc   :  { %v295_v17 = vsel %vm146_vm0, %v293_v15, %v819_v32 }
 0x3bd   :  { %579 = vmatmul.msk.bf16.vlgmr.msra.gmra.mxu3 %vm191_vm3, %v295_v17 }
 0x440   :  { %v348_v20 = vpop.f32.mrf.mxu3 }
 0x441   :  { %v349_v21 = vadd.f32 %v631_v19, %v348_v20 }
 0x443   :  { %v383_v22 = vadd.f32 %v379_v13, %v349_v21 }
 0x445   :  { %v589_v23 = vmul.f32 -1.442695, %v383_v22 }
 0x447   :  { %639 = vpow2.f32 %v589_v23 }
 0x448   :  { %v350_v24 = vpop.f32.mrf.mxu3 }
 0x44d   :  { %v640_v25 = vpop.eup %639 }
 0x44e   :  { %v387_v26 = vadd.f32 1.0, %v640_v25 }
 0x450   :  { %641 = vrcp.f32 %v387_v26  ;;  %v399_v30 = vand.u32 2147483648, %v387_v26  ;;  %v397_v32 = vand.u32 2147483647, %v387_v26  ;;  %vm393_vm9 = vweird.f32 %v387_v26 }
 0x452   :  { %v400_v35 = vor.u32 1.1754944e-38, %v399_v30  ;;  %vm398_vm11 = vcmp.eq.f32.partialorder %v397_v32, 8.507059e+37 }
 0x456   :  { %v642_v27 = vpop.eup %641 }
 0x457   :  { %v389_v28 = vmul.f32 %v642_v27, %v387_v26  ;;  %vm394_vm8 = vweird.f32 %v642_v27 }
 0x458   :  { %vm395_vm10 = vmor %vm393_vm9, %vm394_vm8 }
 0x459   :  { %v390_v29 = vsub.f32 1.0, %v389_v28 }
 0x45b   :  { %v391_v31 = vmul.f32 %v642_v27, %v390_v29 }
 0x45d   :  { %v392_v33 = vadd.f32 %v642_v27, %v391_v31 }
 0x45f   :  { %v396_v36 = vsel %vm395_vm10, %v642_v27, %v392_v33 }
 0x460   :  { %v401_v37 = vsel %vm398_vm11, %v400_v35, %v396_v36 }
 0x461   :  { %v413_v38 = vmul.f32 %v411_v34, %v401_v37 }
 0x463   :  { %415 = vrot.lane.b32.xlu0 %v413_v38, %s672_s29 }
 0x4d5   :  { %v416_v39 = vpop.permute.xlu0 %415 }
 0x4d6   :  { %v418_v40 = vadd.f32 %v416_v39, %v349_v21 }
 0x4d8   :  { %643 = vtanh.f32 %v418_v40 }
 0x4de   :  { %v644_v41 = vpop.eup %643 }
 0x4df   :  { %421 = vrot.lane.b32.xlu1 %v644_v41, %s675_s6 }
 0x4e7   :  { %432 = vrot.lane.b32.xlu1 %v287_v8, %s672_s29 }
 0x551   :  { %v422_v42 = vpop.permute.xlu1 %421 }
 0x552   :  { %v424_v43 = vsub.f32 %v802_v16, %v422_v42 }
 0x554   :  { %v425_v44 = vmul.f32 %v424_v43, %v401_v37 }
 0x556   :  { %427 = vrot.lane.b32.xlu2 %v425_v44, %s673_s5 }
 0x559   :  { %v433_v16 = vpop.permute.xlu1 %432 }
 0x5b0   :  { %v428_v45 = vpop.permute.xlu2 %427 }
 0x5b1   :  { %v430_v46 = vadd.f32 %v644_v41, %v428_v45 }
 0x5b3   :  { %v441_v47 = vpack.c.bf16 %v430_v46, %v430_v46  ;;  %436 = vrot.lane.b32.xlu2 %v430_v46, %s675_s6 }
 0x5b5   :  { %451 = vrot.lane.b32.xlu0 %v441_v47, %s672_s29 }
 0x60d   :  { %v437_v50 = vpop.permute.xlu2 %436 }
 0x60e   :  { %v439_v51 = vsel %vm146_vm0, %v433_v16, %v437_v50 }
 0x60f   :  { %440 = vst.msk [vmem:[%s904_s15] sm:$0xff] %vm191_vm3, %v439_v51 }
 0x627   :  { %v452_v52 = vpop.permute.xlu0 %451 }
 0x628   :  { %598 = vmatmul.msk.bf16.vlgmr.msrb.gmra.mxu1 %vm146_vm0, %v452_v52 }
 0x6a5   :  { %v477_v54 = vpop.f32.mrf.mxu1 }
 0x6a6   :  { %v478_v55 = vadd.f32 %v632_v53, %v477_v54 }
 0x6a8   :  { %481 = vst [vmem:[#allocation2] sm:$0xff] %v478_v55 }
 0x6a9   :  { %492 = dma.vmem_to_hbm [thread:$0]  %s488_s4, 128, %s490_s20, [#allocation3]  }
 0x6ad   :  { %v479_v56 = vpop.f32.mrf.mxu1 }
 0x6ae   :  { %669 = dma.done.wait [#allocation3], 128  }
 0x6af   :  { %670 = vsyncadd [#allocation3], 4294967168 }
 0x6b0   :  { %501 = vsyncpa [#allocation3], 1 }

</bundles_post_ra>
